<compile_context>
chip_gen: v5e
topology: v5e:2x2
jax: 0.10.0
libtpu: 0.0.40
codegen_flags: <defaults>
</compile_context>

<pallas_src>
import jax
import jax.numpy as jnp
from jax.experimental import pallas as pl
from jax.experimental.pallas import tpu as pltpu

# ----------------------------- configuration -------------------------------
NUM_ANCHORS = 3
NUM_CLASSES = 3
STRIDE = 5 + NUM_CLASSES                  # (x, y, w, h, obj, classes...)
OUT_CH = NUM_ANCHORS * STRIDE             # 24 prediction rows
OUT_ROWS = 32                             # 24 preds + 3 conf + 5 pad (8-aligned)
PAD_ROWS = OUT_ROWS - OUT_CH - NUM_ANCHORS
CONF_THRESH = 0.1
MAX_TS = 2048                             # spatial (lane) tile; sweep 512-2048


def _round_up(x, m):
    return ((x + m - 1) // m) * m


# ------------------------------- kernel ------------------------------------
def _detect_kernel(x_ref, w_ref, b_ref, out_ref):
    # x_ref:   (C, TS)        activations, spatial on lanes
    # w_ref:   (OUT_CH, C)    1x1 conv weight (PyTorch [O, C, 1, 1] squeezed)
    # b_ref:   (OUT_CH, 1)    bias
    # out_ref: (OUT_ROWS, TS) rows 0..23 preds, 24..26 conf, 27..31 zero pad
    y = jnp.dot(w_ref[...], x_ref[...],
                preferred_element_type=jnp.float32) + b_ref[...]

    # One EUP pass over the whole tile, then a single VPU select to keep raw
    # w/h logits (channel % STRIDE in {2, 3}) and sigmoid everywhere else.
    sig = jax.nn.sigmoid(y)
    row = jax.lax.broadcasted_iota(jnp.int32, y.shape, 0) % STRIDE
    wh_mask = (row >= 2) & (row < 4)
    preds = jnp.where(wh_mask, y, sig)
    out_ref[0:OUT_CH, :] = preds.astype(out_ref.dtype)

    # Per-anchor confidence = sigmoid(obj) * max_c sigmoid(cls_c); reuses the
    # already-computed sigmoids (max of sigmoids == sigmoid of max).
    conf_rows = []
    for a in range(NUM_ANCHORS):
        base = a * STRIDE
        obj = sig[base + 4:base + 5, :]
        cmax = sig[base + 5:base + 6, :]
        for c in range(1, NUM_CLASSES):
            cmax = jnp.maximum(cmax, sig[base + 5 + c:base + 6 + c, :])
        conf = obj * cmax
        conf_rows.append(jnp.where(conf > CONF_THRESH, conf,
                                   jnp.zeros_like(conf)))
    tail = jnp.concatenate(
        conf_rows + [jnp.zeros((PAD_ROWS, y.shape[1]), jnp.float32)], axis=0)
    out_ref[OUT_CH:OUT_ROWS, :] = tail.astype(out_ref.dtype)


# ------------------------------- wrapper ------------------------------------
@jax.jit
def object_detector_forward(x_nchw, w, b):
    """x_nchw: [B, C, H, W]; w: [OUT_CH, C]; b: [OUT_CH].

    Returns:
      preds: [B, NUM_ANCHORS, STRIDE, H, W]  (xy/obj/cls sigmoided, wh raw)
      conf:  [B, NUM_ANCHORS, H, W]          (zeroed below CONF_THRESH)
    """
    B, C, H, W = x_nchw.shape
    HW = H * W
    x = x_nchw.reshape(B, C, HW)          # free reshape — no transpose pass
    b2 = b.reshape(OUT_CH, 1)

    # Spatial (lane) tile: as big as practical, lane-aligned; pad the tail.
    ts = min(MAX_TS, _round_up(HW, 128))
    hw_pad = _round_up(HW, ts)
    if hw_pad != HW:
        x = jnp.pad(x, ((0, 0), (0, 0), (0, hw_pad - HW)))

    out = pl.pallas_call(
        _detect_kernel,
        out_shape=jax.ShapeDtypeStruct((B, OUT_ROWS, hw_pad), jnp.float32),
        grid_spec=pltpu.PrefetchScalarGridSpec(
            num_scalar_prefetch=0,
            grid=(B, hw_pad // ts),
            in_specs=[
                # activations: batch squeezed, full C on sublanes, TS on lanes
                pl.BlockSpec((None, C, ts), lambda bi, si: (bi, 0, si)),
                # 1x1 conv weight and bias: resident (constant index map)
                pl.BlockSpec((OUT_CH, C), lambda bi, si: (0, 0)),
                pl.BlockSpec((OUT_CH, 1), lambda bi, si: (0, 0)),
            ],
            out_specs=pl.BlockSpec((None, OUT_ROWS, ts),
                                   lambda bi, si: (bi, 0, si)),
        ),
        compiler_params=pltpu.CompilerParams(
            # Both axes independent -> megacore sharding on v7x.
            dimension_semantics=("parallel", "parallel"),
            # Safe across v5e/v6e/v7x; with MAX_TS=2048 and C up to ~1024 f32
            # the double-buffered working set stays well under this.
            vmem_limit_bytes=32 * 1024 * 1024),
    )(x, w, b2)

    out = out[:, :, :HW]
    preds = out[:, :OUT_CH, :].reshape(B, NUM_ANCHORS, STRIDE, H, W)
    conf = out[:, OUT_CH:OUT_CH + NUM_ANCHORS, :].reshape(B, NUM_ANCHORS, H, W)
    return preds, conf


# --------------------------------- main -------------------------------------
if __name__ == "__main__":
    key = jax.random.PRNGKey(0)
    k_x, k_w, k_b = jax.random.split(key, 3)

    B, C, H, W = 2, 4, 16, 16
    x = jax.random.normal(k_x, (B, C, H, W), dtype=jnp.float32)
    w = jax.random.normal(k_w, (OUT_CH, C), dtype=jnp.float32) * 0.1
    b = jax.random.normal(k_b, (OUT_CH,), dtype=jnp.float32) * 0.01

    preds, conf = object_detector_forward(x, w, b)
    jax.block_until_ready((preds, conf))

    assert preds.shape == (B, NUM_ANCHORS, STRIDE, H, W)
    assert conf.shape == (B, NUM_ANCHORS, H, W)
    # sanity: sigmoid-activated channels are in (0, 1); conf in [0, 1]
    assert bool(jnp.all((preds[:, :, 0:2] > 0) & (preds[:, :, 0:2] < 1)))
    assert bool(jnp.all((preds[:, :, 4:] > 0) & (preds[:, :, 4:] < 1)))
    assert bool(jnp.all((conf >= 0) & (conf <= 1)))
    assert bool(jnp.all(jnp.isfinite(preds)))
    print("KERNEL_OK")
</pallas_src>

<mosaic_0001>
module attributes {stable_mosaic.version = 11 : i64} {
  func.func @_detect_kernel(%arg0: i32, %arg1: i32, %arg2: memref<1x4x256xf32, #tpu.memory_space<vmem>>, %arg3: memref<24x4xf32, #tpu.memory_space<vmem>>, %arg4: memref<24x1xf32, #tpu.memory_space<vmem>>, %arg5: memref<1x32x256xf32, #tpu.memory_space<vmem>>) attributes {dimension_semantics = [#tpu.dimension_semantics<parallel>, #tpu.dimension_semantics<parallel>], iteration_bounds = array<i64: 2, 1>, scalar_prefetch = 0 : i64, scratch_operands = 0 : i64, tpu.core_type = #tpu.core_type<tc>, window_params = [{transform_indices = @transform_0, window_bounds = array<i64: 1, 4, 256>}, {pipeline_mode = #tpu.pipeline_mode<synchronous>, transform_indices = @transform_1, window_bounds = array<i64: 24, 4>}, {pipeline_mode = #tpu.pipeline_mode<synchronous>, transform_indices = @transform_2, window_bounds = array<i64: 24, 1>}, {transform_indices = @transform_3, window_bounds = array<i64: 1, 32, 256>}]} {
    %c0 = arith.constant 0 : index
    %c0_0 = arith.constant 0 : index
    %0 = vector.load %arg3[%c0, %c0_0] : memref<24x4xf32, #tpu.memory_space<vmem>>, vector<24x4xf32>
    %c0_1 = arith.constant 0 : index
    %c0_2 = arith.constant 0 : index
    %c0_3 = arith.constant 0 : index
    %1 = vector.load %arg2[%c0_1, %c0_2, %c0_3] : memref<1x4x256xf32, #tpu.memory_space<vmem>>, vector<1x4x256xf32>
    %2 = vector.shape_cast %1 : vector<1x4x256xf32> to vector<4x256xf32>
    %cst = arith.constant dense<0.000000e+00> : vector<24x256xf32>
    %3 = tpu.matmul %0, %2, %cst {dimension_numbers = #tpu.dot_dimension_numbers<[1], [0], [0], [1], [0, 0, 1, 1], [], []>} : vector<24x4xf32>, vector<4x256xf32>, vector<24x256xf32> -> vector<24x256xf32>
    %c0_4 = arith.constant 0 : index
    %c0_5 = arith.constant 0 : index
    %4 = vector.load %arg4[%c0_4, %c0_5] : memref<24x1xf32, #tpu.memory_space<vmem>>, vector<24x1xf32>
    %5 = vector.broadcast %4 : vector<24x1xf32> to vector<24x256xf32>
    %6 = arith.addf %3, %5 : vector<24x256xf32>
    %7 = arith.negf %6 : vector<24x256xf32>
    %8 = math.exp %7 : vector<24x256xf32>
    %cst_6 = arith.constant 1.000000e+00 : f32
    %9 = vector.broadcast %cst_6 : f32 to vector<24x256xf32>
    %10 = arith.addf %9, %8 : vector<24x256xf32>
    %11 = arith.divf %9, %10 : vector<24x256xf32>
    %12 = tpu.iota {dimensions = array<i32: 0>} : vector<24x256xi32>
    %c8_i32 = arith.constant 8 : i32
    %c0_i32 = arith.constant 0 : i32
    %13 = arith.cmpi eq, %c8_i32, %c0_i32 : i32
    %c1_i32 = arith.constant 1 : i32
    %14 = arith.select %13, %c1_i32, %c8_i32 : i32
    %15 = vector.broadcast %14 : i32 to vector<24x256xi32>
    %16 = arith.remsi %12, %15 : vector<24x256xi32>
    %c0_i32_7 = arith.constant 0 : i32
    %17 = vector.broadcast %c0_i32_7 : i32 to vector<24x256xi32>
    %18 = arith.cmpi ne, %16, %17 : vector<24x256xi32>
    %c0_i32_8 = arith.constant 0 : i32
    %19 = vector.broadcast %c0_i32_8 : i32 to vector<24x256xi32>
    %20 = arith.cmpi slt, %16, %19 : vector<24x256xi32>
    %c0_i32_9 = arith.constant 0 : i32
    %21 = arith.cmpi slt, %14, %c0_i32_9 : i32
    %22 = vector.broadcast %21 : i1 to vector<24x256xi1>
    %23 = vector.broadcast %22 : vector<24x256xi1> to vector<24x256xi1>
    %24 = arith.xori %20, %23 : vector<24x256xi1>
    %25 = arith.andi %24, %18 : vector<24x256xi1>
    %26 = vector.broadcast %14 : i32 to vector<24x256xi32>
    %27 = arith.addi %16, %26 : vector<24x256xi32>
    %28 = arith.select %25, %27, %16 : vector<24x256xi1>, vector<24x256xi32>
    %c2_i32 = arith.constant 2 : i32
    %29 = vector.broadcast %c2_i32 : i32 to vector<24x256xi32>
    %30 = arith.cmpi sge, %28, %29 : vector<24x256xi32>
    %c4_i32 = arith.constant 4 : i32
    %31 = vector.broadcast %c4_i32 : i32 to vector<24x256xi32>
    %32 = arith.cmpi slt, %28, %31 : vector<24x256xi32>
    %33 = arith.andi %30, %32 : vector<24x256xi1>
    %34 = arith.select %33, %6, %11 : vector<24x256xi1>, vector<24x256xf32>
    %c0_10 = arith.constant 0 : index
    %c0_11 = arith.constant 0 : index
    %c0_12 = arith.constant 0 : index
    %35 = vector.load %arg5[%c0_10, %c0_11, %c0_12] : memref<1x32x256xf32, #tpu.memory_space<vmem>>, vector<1x24x256xf32>
    %36 = vector.shape_cast %35 : vector<1x24x256xf32> to vector<24x256xf32>
    %37 = vector.shape_cast %34 : vector<24x256xf32> to vector<1x24x256xf32>
    tpu.vector_store %arg5[%c0_10, %c0_11, %c0_12], %37 {strides = array<i32>} : memref<1x32x256xf32, #tpu.memory_space<vmem>>, vector<1x24x256xf32>,
    %38 = vector.extract_strided_slice %11 {offsets = [4, 0], sizes = [1, 256], strides = [1, 1]} : vector<24x256xf32> to vector<1x256xf32>
    %39 = vector.extract_strided_slice %11 {offsets = [5, 0], sizes = [1, 256], strides = [1, 1]} : vector<24x256xf32> to vector<1x256xf32>
    %40 = vector.extract_strided_slice %11 {offsets = [6, 0], sizes = [1, 256], strides = [1, 1]} : vector<24x256xf32> to vector<1x256xf32>
    %41 = arith.maximumf %39, %40 : vector<1x256xf32>
    %42 = vector.extract_strided_slice %11 {offsets = [7, 0], sizes = [1, 256], strides = [1, 1]} : vector<24x256xf32> to vector<1x256xf32>
    %43 = arith.maximumf %41, %42 : vector<1x256xf32>
    %44 = arith.mulf %38, %43 : vector<1x256xf32>
    %cst_13 = arith.constant 1.000000e-01 : f32
    %45 = vector.broadcast %cst_13 : f32 to vector<1x256xf32>
    %46 = arith.cmpf ogt, %44, %45 : vector<1x256xf32>
    %cst_14 = arith.constant 0.000000e+00 : f32
    %47 = vector.broadcast %cst_14 : f32 to vector<1x256xf32>
    %48 = arith.select %46, %44, %47 : vector<1x256xi1>, vector<1x256xf32>
    %49 = vector.extract_strided_slice %11 {offsets = [12, 0], sizes = [1, 256], strides = [1, 1]} : vector<24x256xf32> to vector<1x256xf32>
    %50 = vector.extract_strided_slice %11 {offsets = [13, 0], sizes = [1, 256], strides = [1, 1]} : vector<24x256xf32> to vector<1x256xf32>
    %51 = vector.extract_strided_slice %11 {offsets = [14, 0], sizes = [1, 256], strides = [1, 1]} : vector<24x256xf32> to vector<1x256xf32>
    %52 = arith.maximumf %50, %51 : vector<1x256xf32>
    %53 = vector.extract_strided_slice %11 {offsets = [15, 0], sizes = [1, 256], strides = [1, 1]} : vector<24x256xf32> to vector<1x256xf32>
    %54 = arith.maximumf %52, %53 : vector<1x256xf32>
    %55 = arith.mulf %49, %54 : vector<1x256xf32>
    %cst_15 = arith.constant 1.000000e-01 : f32
    %56 = vector.broadcast %cst_15 : f32 to vector<1x256xf32>
    %57 = arith.cmpf ogt, %55, %56 : vector<1x256xf32>
    %cst_16 = arith.constant 0.000000e+00 : f32
    %58 = vector.broadcast %cst_16 : f32 to vector<1x256xf32>
    %59 = arith.select %57, %55, %58 : vector<1x256xi1>, vector<1x256xf32>
    %60 = vector.extract_strided_slice %11 {offsets = [20, 0], sizes = [1, 256], strides = [1, 1]} : vector<24x256xf32> to vector<1x256xf32>
    %61 = vector.extract_strided_slice %11 {offsets = [21, 0], sizes = [1, 256], strides = [1, 1]} : vector<24x256xf32> to vector<1x256xf32>
    %62 = vector.extract_strided_slice %11 {offsets = [22, 0], sizes = [1, 256], strides = [1, 1]} : vector<24x256xf32> to vector<1x256xf32>
    %63 = arith.maximumf %61, %62 : vector<1x256xf32>
    %64 = vector.extract_strided_slice %11 {offsets = [23, 0], sizes = [1, 256], strides = [1, 1]} : vector<24x256xf32> to vector<1x256xf32>
    %65 = arith.maximumf %63, %64 : vector<1x256xf32>
    %66 = arith.mulf %60, %65 : vector<1x256xf32>
    %cst_17 = arith.constant 1.000000e-01 : f32
    %67 = vector.broadcast %cst_17 : f32 to vector<1x256xf32>
    %68 = arith.cmpf ogt, %66, %67 : vector<1x256xf32>
    %cst_18 = arith.constant 0.000000e+00 : f32
    %69 = vector.broadcast %cst_18 : f32 to vector<1x256xf32>
    %70 = arith.select %68, %66, %69 : vector<1x256xi1>, vector<1x256xf32>
    %cst_19 = arith.constant 0.000000e+00 : f32
    %71 = vector.broadcast %cst_19 : f32 to vector<5x256xf32>
    %72 = tpu.concatenate %48, %59, %70, %71 in 0 : vector<1x256xf32>, vector<1x256xf32>, vector<1x256xf32>, vector<5x256xf32> -> vector<8x256xf32>
    %c0_20 = arith.constant 0 : index
    %c24 = arith.constant 24 : index
    %c0_21 = arith.constant 0 : index
    %73 = vector.load %arg5[%c0_20, %c24, %c0_21] : memref<1x32x256xf32, #tpu.memory_space<vmem>>, vector<1x8x256xf32>
    %74 = vector.shape_cast %73 : vector<1x8x256xf32> to vector<8x256xf32>
    %75 = vector.shape_cast %72 : vector<8x256xf32> to vector<1x8x256xf32>
    tpu.vector_store %arg5[%c0_20, %c24, %c0_21], %75 {strides = array<i32>} : memref<1x32x256xf32, #tpu.memory_space<vmem>>, vector<1x8x256xf32>,
    return
  }
  func.func @transform_0(%arg0: i32, %arg1: i32) -> (i32, i32, i32) {
    %c0_i32 = arith.constant 0 : i32
    %c0_i32_0 = arith.constant 0 : i32
    return %arg0, %c0_i32, %arg1 : i32, i32, i32
  }
  func.func @transform_1(%arg0: i32, %arg1: i32) -> (i32, i32) {
    %c0_i32 = arith.constant 0 : i32
    %c0_i32_0 = arith.constant 0 : i32
    %c0_i32_1 = arith.constant 0 : i32
    return %c0_i32, %c0_i32_0 : i32, i32
  }
  func.func @transform_2(%arg0: i32, %arg1: i32) -> (i32, i32) {
    %c0_i32 = arith.constant 0 : i32
    %c0_i32_0 = arith.constant 0 : i32
    %c0_i32_1 = arith.constant 0 : i32
    return %c0_i32, %c0_i32_0 : i32, i32
  }
  func.func @transform_3(%arg0: i32, %arg1: i32) -> (i32, i32, i32) {
    %c0_i32 = arith.constant 0 : i32
    %c0_i32_0 = arith.constant 0 : i32
    return %arg0, %c0_i32, %arg1 : i32, i32, i32
  }
}

</mosaic_0001>

<bundles_post_ra>
// kernel: object_detector_forward.1
= control target key start
LH: loop header
LB: loop body
LE: loop exit
PB: predicated region body
PF: predicated region fallthrough
CT: control target
= control target key end

     0   :  { %s797_s12 = smov 0   ;;  %s799_s13 = smov 0   ;;  %s1020_s0 = inlined_call_operand.vmem [shape: f32[2,4,256], index: 0, kind: input, shape index: {}]   ;;  %s1021_s1 = inlined_call_operand.vmem [shape: f32[24,4], index: 1, kind: input, shape index: {}]   ;;  %s1022_s2 = inlined_call_operand.vmem [shape: f32[24,1], index: 2, kind: input, shape index: {}]   ;;  %s1023_s3 = inlined_call_operand.vmem [shape: f32[2,32,256], index: 3, kind: output, shape index: {}]  }
   0x1   :  { %s801_s14 = smov 0  }
   0x2 LB: > { %s25_s15 = sadd.s32 1, %s770_s13  ;;  %p676_p0 = scmp.ge.s32.totalorder %s774_s14, 1  ;;  %s774_s14 = sphi %s801_s14, %s13_s14   ;;  %s770_s13 = sphi %s799_s13, %s1039_s13   ;;  %s766_s12 = sphi %s797_s12, %s1038_s12  }
   0x3   : > { %p27_p1 = scmp.ge.s32.totalorder %s25_s15, 2  ;;  %p158_p2 = scmp.lt.s32.totalorder %s774_s14, 3 }
   0x5   : > { %s1041_s15 = smov (%p27_p1, %s25_s15), 0  ;;  %p159_p3 = pnand %p676_p0, %p158_p2 }
   0x6   : > { %p191_p4 = scmp.lt.s32.totalorder (!%p159_p3), %s766_s12, 1 }
   0x7   : > { %162 = sbr.rel (%p159_p3) target bundleno = 219 (0xdb), region = 32 }
   0xc   : > { %v776_v0 = vmov 0   ;;  %v214_v1 = vld [vmem:[%s1022_s2] sm:$0xff]  ;;  %s1043_s12 = smov (!%p191_p4, %s766_s12), 1  ;;  %v216_v2 = vld [vmem:[%s1022_s2 + $0x10] sm:$0xff]  ;;  %v215_v4 = vld [vmem:[%s1022_s2 + $0x8] sm:$0xff]  ;;  %vm246_vm0 = vcmask 1043456   ;;  %v417_v25 = vlaneseq }
   0xd   : > { %726 = vset.pattern.permute.xlu0 %v776_v0  ;;  %727 = vset.pattern.permute.xlu1 %v776_v0  ;;  %s697_s20 = sshll.u32 %s1043_s12, 3  ;;  %v210_v5 = vld [vmem:[%s1021_s1] sm:$0xff]  ;;  %vm236_vm1 = vcmask 31744   ;;  %v211_v6 = vld [vmem:[%s1021_s1 + $0x8] sm:$0xff]  ;;  %v212_v9 = vld [vmem:[%s1021_s1 + $0x10] sm:$0xff]  ;;  %s698_s5 = sshll.u32 %s1043_s12, 6 }
   0xe   : > { %219 = vperm.xlu0 %726, %v214_v1   ;;  %229 = vperm.xlu1 %727, %v216_v2   ;;  %s198_s23 = scalar_lea.vmem %s1020_s0, %s697_s20  ;;  %v851_v31 = vshrl.u32 %v417_v25, 7  ;;  %s897_s8 = scalar_lea.vmem %s1023_s3, %s698_s5 }
   0xf   : > { %v213_v3 = vld [vmem:[%s198_s23] sm:$0xff] }
  0x10   : > { %233 = vst [vmem:[#allocation1] ss:$2 sm:$0xff] %v213_v3  ;;  %v419_v37 = vadd.s32 8, %v851_v31  ;;  %v425_v38 = vand.u32 7, %v851_v31  ;;  %v420_v25 = vadd.s32 16, %v851_v31 }
  0x12   : > { %v432_v46 = vand.u32 7, %v419_v37  ;;  %vm866_vm2 = vcmp.ge.s32.totalorder %v425_v38, 2  ;;  %vm870_vm3 = vcmp.lt.s32.totalorder %v425_v38, 4  ;;  %v439_v37 = vand.u32 7, %v420_v25 }
  0x13   : > { %vm463_vm9 = vmand %vm866_vm2, %vm870_vm3 }
  0x14   : > { %vm876_vm7 = vcmp.ge.s32.totalorder %v432_v46, 2  ;;  %vm916_vm14 = vcmp.lt.s32.totalorder %v432_v46, 4 }
  0x15   : > { %vm464_vm2 = vmand %vm876_vm7, %vm916_vm14  ;;  %vm974_vm7 = vcmp.lt.s32.totalorder %v439_v37, 4 }
  0x16   : > { %224 = vperm.xlu0 %726, %v215_v4  }
  0x17   : > { %v234_v7 = vld.sshfl [vmem:[#allocation1] sm:$0xff pattern:$0x75316420]  ;;  %v235_v8 = vld.sshfl [vmem:[#allocation1 + $0x8] sm:$0xff pattern:$0x75316420] }
  0x18   : > { %681 = vmatpush.msk.msra.mxu0 %vm246_vm0, %v234_v7  ;;  %699 = vmatpush.msk.msra.mxu2 %vm246_vm0, %v234_v7 }
  0x19   : > { %685 = vmatpush.msk.msra.mxu1 %vm246_vm0, %v235_v8  ;;  %700 = vmatpush.msk.msra.mxu3 %vm246_vm0, %v235_v8 }
  0x1a   : > { %682 = vmatmul.msk.f32.vlgmr.msra.gmra.mxu0 %vm236_vm1, %v210_v5  ;;  %683 = vmatmul.msk.f32.vlgmr.msra.gmra.mxu2 %vm236_vm1, %v211_v6 }
  0x1b   : > { %686 = vmatmul.msk.f32.vlgmr.msra.gmra.mxu1 %vm236_vm1, %v210_v5  ;;  %687 = vmatmul.msk.f32.vlgmr.msra.gmra.mxu3 %vm236_vm1, %v211_v6 }
  0x22   : > { %684 = vmatmul.msk.f32.gmra.mxu2 %vm236_vm1, %v212_v9 }
  0x23   : > { %688 = vmatmul.msk.f32.gmra.mxu3 %vm236_vm1, %v212_v9 }
  0x80   : > { %v220_v10 = vpop.permute.xlu0 %219  ;;  %v230_v29 = vpop.permute.xlu1 %229 }
  0x88   : > { %v225_v17 = vpop.permute.xlu0 %224 }
  0x97   : > { %v268_v11 = vpop.f32.mrf.mxu0 }
  0x98   : > { %v839_v12 = vadd.f32 %v268_v11, %v220_v10  ;;  %v294_v13 = vpop.f32.mrf.mxu1 }
  0x99   : > { %v841_v14 = vadd.f32 %v294_v13, %v220_v10 }
  0x9a   : > { %v689_v15 = vmul.f32 -1.442695, %v839_v12 }
  0x9b   : > { %v690_v16 = vmul.f32 -1.442695, %v841_v14 }
  0x9c   : > { %728 = vpow2.f32 %v689_v15 }
  0x9d   : > { %730 = vpow2.f32 %v690_v16  ;;  %v271_v18 = vpop.f32.mrf.mxu2 }
  0x9e   : > { %v845_v19 = vadd.f32 %v271_v18, %v225_v17  ;;  %v297_v20 = vpop.f32.mrf.mxu3 }
  0x9f   : > { %v847_v21 = vadd.f32 %v297_v20, %v225_v17 }
  0xa0   : > { %v691_v22 = vmul.f32 -1.442695, %v845_v19 }
  0xa1   : > { %v692_v23 = vmul.f32 -1.442695, %v847_v21 }
  0xa2   : > { %v729_v24 = vpop.eup %728  ;;  %732 = vpow2.f32 %v691_v22 }
  0xa3   : > { %v731_v26 = vpop.eup %730  ;;  %v321_v27 = vadd.f32 1.0, %v729_v24  ;;  %734 = vpow2.f32 %v692_v23 }
  0xa4   : > { %v322_v28 = vadd.f32 1.0, %v731_v26 }
  0xa5   : > { %736 = vrcp.f32 %v321_v27  ;;  %v274_v30 = vpop.f32.mrf.mxu2  ;;  %v336_v48 = vand.u32 2147483647, %v321_v27  ;;  %v338_v50 = vand.u32 2147483648, %v321_v27  ;;  %vm332_vm5 = vweird.f32 %v321_v27 }
  0xa6   : > { %738 = vrcp.f32 %v322_v28  ;;  %v853_v32 = vadd.f32 %v274_v30, %v230_v29  ;;  %v300_v34 = vpop.f32.mrf.mxu3  ;;  %v351_v55 = vand.u32 2147483647, %v322_v28  ;;  %v353_v56 = vand.u32 2147483648, %v322_v28 }
  0xa7   : > { %v863_v42 = vadd.f32 %v300_v34, %v230_v29  ;;  %vm882_vm8 = vcmp.eq.f32.partialorder %v336_v48, 8.507059e+37  ;;  %vm347_vm10 = vweird.f32 %v322_v28  ;;  %v339_v0 = vor.u32 1.1754944e-38, %v338_v50 }
  0xa8   : > { %v733_v33 = vpop.eup %732  ;;  %v693_v40 = vmul.f32 -1.442695, %v853_v32  ;;  %vm352_vm13 = vcmp.eq.f32.partialorder %v351_v55, 8.507059e+37  ;;  %v354_v5 = vor.u32 1.1754944e-38, %v353_v56 }
  0xa9   : > { %v735_v35 = vpop.eup %734  ;;  %v855_v36 = vadd.f32 1.0, %v733_v33  ;;  %v694_v53 = vmul.f32 -1.442695, %v863_v42 }
  0xaa   : > { %v859_v39 = vadd.f32 1.0, %v735_v35 }
  0xab   : > { %v737_v41 = vpop.eup %736  ;;  %740 = vrcp.f32 %v855_v36  ;;  %v368_v15 = vand.u32 2147483648, %v855_v36  ;;  %vm362_vm1 = vweird.f32 %v855_v36 }
  0xac   : > { %v739_v43 = vpop.eup %738  ;;  %v328_v44 = vmul.f32 %v737_v41, %v321_v27  ;;  %742 = vrcp.f32 %v859_v39  ;;  %vm333_vm4 = vweird.f32 %v737_v41  ;;  %v383_v22 = vand.u32 2147483648, %v859_v39 }
  0xad   : > { %v343_v45 = vmul.f32 %v739_v43, %v322_v28  ;;  %744 = vpow2.f32 %v693_v40  ;;  %vm348_vm6 = vweird.f32 %v739_v43  ;;  %vm334_vm11 = vmor %vm332_vm5, %vm333_vm4  ;;  %v369_v27 = vor.u32 1.1754944e-38, %v368_v15 }
  0xae   : > { %v329_v47 = vsub.f32 1.0, %v328_v44  ;;  %746 = vpow2.f32 %v694_v53  ;;  %vm349_vm12 = vmor %vm347_vm10, %vm348_vm6  ;;  %vm377_vm4 = vweird.f32 %v859_v39  ;;  %v384_v34 = vor.u32 1.1754944e-38, %v383_v22 }
  0xaf   : > { %v344_v52 = vsub.f32 1.0, %v343_v45 }
  0xb0   : > { %v330_v54 = vmul.f32 %v737_v41, %v329_v47 }
  0xb1   : > { %v741_v57 = vpop.eup %740  ;;  %v345_v58 = vmul.f32 %v739_v43, %v344_v52 }
  0xb2   : > { %v880_v60 = vpop.eup %742  ;;  %v331_v61 = vadd.f32 %v737_v41, %v330_v54  ;;  %v358_v63 = vmul.f32 %v741_v57, %v855_v36  ;;  %vm363_vm15 = vweird.f32 %v741_v57 }
  0xb3   : > { %v346_v1 = vadd.f32 %v739_v43, %v345_v58  ;;  %v373_v2 = vmul.f32 %v880_v60, %v859_v39  ;;  %v745_v3 = vpop.eup %744  ;;  %vm378_vm0 = vweird.f32 %v880_v60  ;;  %vm364_vm3 = vmor %vm362_vm1, %vm363_vm15 }
  0xb4   : > { %v335_v4 = vsel %vm334_vm11, %v737_v41, %v331_v61  ;;  %v359_v6 = vsub.f32 1.0, %v358_v63  ;;  %v904_v10 = vadd.f32 1.0, %v745_v3  ;;  %v747_v23 = vpop.eup %746  ;;  %vm379_vm6 = vmor %vm377_vm4, %vm378_vm0 }
  0xb5   : > { %v902_v7 = vsel %vm882_vm8, %v339_v0, %v335_v4  ;;  %v350_v8 = vsel %vm349_vm12, %v739_v43, %v346_v1  ;;  %v374_v9 = vsub.f32 1.0, %v373_v2  ;;  %v947_v31 = vadd.f32 1.0, %v747_v23 }
  0xb6   : > { %v466_v11 = vsel %vm463_vm9, %v839_v12, %v902_v7  ;;  %v913_v13 = vsel %vm352_vm13, %v354_v5, %v350_v8  ;;  %v360_v18 = vmul.f32 %v741_v57, %v359_v6  ;;  %v366_v12 = vand.u32 2147483647, %v855_v36 }
  0xb7   : > { %472 = vst [vmem:[%s897_s8] sm:$0xff] %v466_v11  ;;  %v467_v17 = vsel %vm463_vm9, %v841_v14, %v913_v13  ;;  %v375_v20 = vmul.f32 %v880_v60, %v374_v9  ;;  %748 = vrcp.f32 %v904_v10  ;;  %v381_v14 = vand.u32 2147483647, %v859_v39 }
  0xb8   : > { %473 = vst [vmem:[%s897_s8 + $0x8] sm:$0xff] %v467_v17  ;;  %v361_v24 = vadd.f32 %v741_v57, %v360_v18  ;;  %v480_v26 = vrot.slane %v902_v7, 1  ;;  %vm367_vm5 = vcmp.eq.f32.partialorder %v366_v12, 8.507059e+37  ;;  %v481_v40 = vrot.slane %v913_v13, 1 }
  0xb9   : > { %v376_v28 = vadd.f32 %v880_v60, %v375_v20  ;;  %vm382_vm8 = vcmp.eq.f32.partialorder %v381_v14, 8.507059e+37  ;;  %750 = vrcp.f32 %v947_v31  ;;  %v486_v47 = vrot.slane %v902_v7, 2 }
  0xba   : > { %v365_v29 = vsel %vm364_vm3, %v741_v57, %v361_v24  ;;  %v484_v39 = vmax.f32 %v902_v7, %v480_v26  ;;  %vm968_vm9 = vcmp.ge.s32.totalorder %v439_v37, 2  ;;  %v485_v53 = vmax.f32 %v913_v13, %v481_v40 }
  0xbb   : > { %v370_v30 = vsel %vm367_vm5, %v369_v27, %v365_v29  ;;  %v380_v33 = vsel %vm379_vm6, %v880_v60, %v376_v28  ;;  %v398_v54 = vand.u32 2147483648, %v904_v10  ;;  %v396_v58 = vand.u32 2147483647, %v904_v10  ;;  %vm465_vm12 = vmand %vm968_vm9, %vm974_vm7 }
  0xbc   : > { %v468_v35 = vsel %vm464_vm2, %v845_v19, %v370_v30  ;;  %v506_v36 = vrot.slane %v370_v30, 1  ;;  %v385_v41 = vsel %vm382_vm8, %v384_v34, %v380_v33  ;;  %v512_v44 = vrot.slane %v370_v30, 2 }
  0xbd   : > { %v749_v38 = vpop.eup %748  ;;  %474 = vst [vmem:[%s897_s8 + $0x10] sm:$0xff] %v468_v35  ;;  %v469_v19 = vsel %vm464_vm2, %v847_v21, %v385_v41  ;;  %v507_v45 = vrot.slane %v385_v41, 1  ;;  %v490_v52 = vmax.f32 %v484_v39, %v486_v47  ;;  %v513_v56 = vrot.slane %v385_v41, 2 }
  0xbe   : > { %v510_v43 = vmax.f32 %v370_v30, %v506_v36  ;;  %475 = vst [vmem:[%s897_s8 + $0x18] sm:$0xff] %v469_v19  ;;  %v388_v46 = vmul.f32 %v749_v38, %v904_v10  ;;  %vm393_vm10 = vweird.f32 %v749_v38  ;;  %v487_v59 = vrot.slane %v913_v13, 2 }
  0xbf   : > { %v511_v49 = vmax.f32 %v385_v41, %v507_v45  ;;  %v751_v55 = vpop.eup %750  ;;  %vm392_vm11 = vweird.f32 %v904_v10  ;;  %v494_v0 = vrot.slane %v490_v52, 1  ;;  %v399_v2 = vor.u32 1.1754944e-38, %v398_v54 }
  0xc0   : > { %v516_v48 = vmax.f32 %v510_v43, %v512_v44  ;;  %v389_v50 = vsub.f32 1.0, %v388_v46  ;;  %v403_v61 = vmul.f32 %v751_v55, %v947_v31  ;;  %v491_v1 = vmax.f32 %v485_v53, %v487_v59  ;;  %vm394_vm13 = vmor %vm392_vm11, %vm393_vm10 }
  0xc1   : > { %v517_v62 = vmax.f32 %v511_v49, %v513_v56  ;;  %vm397_vm14 = vcmp.eq.f32.partialorder %v396_v58, 8.507059e+37  ;;  %v411_v5 = vand.u32 2147483647, %v947_v31  ;;  %v413_v6 = vand.u32 2147483648, %v947_v31 }
  0xc2   : > { %v390_v57 = vmul.f32 %v749_v38, %v389_v50  ;;  %v520_v60 = vrot.slane %v516_v48, 1  ;;  %v404_v3 = vsub.f32 1.0, %v403_v61  ;;  %vm408_vm15 = vweird.f32 %v751_v55 }
  0xc3   : > { %v521_v11 = vrot.slane %v517_v62, 1  ;;  %v498_v17 = vmul.f32 %v494_v0, %v902_v7  ;;  %vm407_vm0 = vweird.f32 %v947_v31  ;;  %v495_v12 = vrot.slane %v491_v1, 1 }
  0xc4   : > { %v391_v63 = vadd.f32 %v749_v38, %v390_v57  ;;  %v524_v8 = vmul.f32 %v520_v60, %v370_v30  ;;  %v405_v10 = vmul.f32 %v751_v55, %v404_v3  ;;  %vm409_vm1 = vmor %vm407_vm0, %vm408_vm15  ;;  %v414_v23 = vor.u32 1.1754944e-38, %v413_v6 }
  0xc5   : > { %vm412_vm3 = vcmp.eq.f32.partialorder %v411_v5, 8.507059e+37  ;;  %v525_v14 = vmul.f32 %v521_v11, %v385_v41  ;;  %vm500_vm4 = vcmp.gt.f32.partialorder %v498_v17, 0.1  ;;  %v499_v27 = vmul.f32 %v495_v12, %v913_v13 }
  0xc6   : > { %v395_v4 = vsel %vm394_vm13, %v749_v38, %v391_v63  ;;  %v406_v18 = vadd.f32 %v751_v55, %v405_v10  ;;  %vm526_vm2 = vcmp.gt.f32.partialorder %v524_v8, 0.1  ;;  %v502_v34 = vsel %vm500_vm4, %v498_v17, 0.0 }
  0xc7   : > { %v400_v9 = vsel %vm397_vm14, %v399_v2, %v395_v4  ;;  %v528_v28 = vsel %vm526_vm2, %v524_v8, 0.0  ;;  %vm527_vm5 = vcmp.gt.f32.partialorder %v525_v14, 0.1  ;;  %vm501_vm6 = vcmp.gt.f32.partialorder %v499_v27, 0.1 }
  0xc8   : > { %v470_v15 = vsel %vm465_vm12, %v853_v32, %v400_v9  ;;  %v532_v16 = vrot.slane %v400_v9, 1  ;;  %v538_v22 = vrot.slane %v400_v9, 2  ;;  %v410_v24 = vsel %vm409_vm1, %v751_v55, %v406_v18 }
  0xc9   : > { %476 = vst [vmem:[%s897_s8 + $0x20] sm:$0xff] %v470_v15  ;;  %v415_v26 = vsel %vm412_vm3, %v414_v23, %v410_v24  ;;  %v564_v35 = vrot.slane %v528_v28, 3  ;;  %vm574_vm8 = vcmask 1040384   ;;  %vm577_vm11 = vcmask 1041408  }
  0xca   : > { %v536_v20 = vmax.f32 %v400_v9, %v532_v16  ;;  %v471_v32 = vsel %vm465_vm12, %v863_v42, %v415_v26  ;;  %v533_v7 = vrot.slane %v415_v26, 1  ;;  %v539_v33 = vrot.slane %v415_v26, 2 }
  0xcb   : > { %477 = vst [vmem:[%s897_s8 + $0x28] sm:$0xff] %v471_v32  ;;  %v558_v37 = vrot.slane %v502_v34, 4  ;;  %v529_v42 = vsel %vm527_vm5, %v525_v14, 0.0  ;;  %vm580_vm9 = vcmask 1042432   ;;  %v503_v40 = vsel %vm501_vm6, %v499_v27, 0.0 }
  0xcc   : > { %v542_v25 = vmax.f32 %v536_v20, %v538_v22  ;;  %v537_v30 = vmax.f32 %v415_v26, %v533_v7  ;;  %v565_v44 = vrot.slane %v529_v42, 3  ;;  %v559_v46 = vrot.slane %v503_v40, 4 }
  0xcd   : > { %v575_v41 = vsel %vm574_vm8, %v558_v37, %v564_v35 }
  0xce   : > { %v546_v29 = vrot.slane %v542_v25, 1  ;;  %v543_v36 = vmax.f32 %v537_v30, %v539_v33  ;;  %v576_v49 = vsel %vm574_vm8, %v559_v46, %v565_v44 }
  0xd0   : > { %v550_v31 = vmul.f32 %v546_v29, %v400_v9  ;;  %v547_v39 = vrot.slane %v543_v36, 1 }
  0xd2   : > { %vm552_vm10 = vcmp.gt.f32.partialorder %v550_v31, 0.1  ;;  %v551_v43 = vmul.f32 %v547_v39, %v415_v26 }
  0xd3   : > { %v554_v38 = vsel %vm552_vm10, %v550_v31, 0.0 }
  0xd4   : > { %v570_v13 = vrot.slane %v554_v38, 2  ;;  %vm553_vm7 = vcmp.gt.f32.partialorder %v551_v43, 0.1 }
  0xd5   : > { %v555_v47 = vsel %vm553_vm7, %v551_v43, 0.0 }
  0xd6   : > { %v578_v19 = vsel %vm577_vm11, %v575_v41, %v570_v13  ;;  %v571_v48 = vrot.slane %v555_v47, 2 }
  0xd7   : > { %v581_v45 = vsel %vm580_vm9, %v578_v19, 0.0 }
  0xd8   : > { %583 = vst [vmem:[%s897_s8 + $0x30] sm:$0xff] %v581_v45  ;;  %v579_v50 = vsel %vm577_vm11, %v576_v49, %v571_v48 }
  0xd9   : > { %v582_v51 = vsel %vm580_vm9, %v579_v50, 0.0 }
  0xda   : > { %584 = vst [vmem:[%s897_s8 + $0x38] sm:$0xff] %v582_v51 }
  0xdb PF: > { %s13_s14 = sadd.s32 1, %s774_s14   ;;  %s1038_s12 = smov %s770_s13 }
  0xdc   : > { %p10_p5 = scmp.ge.s32.totalorder %s13_s14, 4   ;;  %s1039_s13 = smov %s1041_s15 }
  0xde   :  { %12 = sbr.rel (!%p10_p5) target bundleno = 2 (0x2), region = 62 }

</bundles_post_ra>
